<compile_context>
chip_gen: v7x
topology: tpu7x:2x2x1
jax: 0.10.0
libtpu: 0.0.40
codegen_flags: <defaults>
</compile_context>

<pallas_src>
import functools

import jax
import jax.numpy as jnp
from jax.experimental import pallas as pl
from jax.experimental.pallas import tpu as pltpu

EPS = 1e-5
_VMEM_LIMIT_BYTES = 48 * 1024 * 1024   # < 64 MiB physical on v7x; > scoped defaults everywhere
_TILE_BUDGET_BYTES = 40 * 1024 * 1024  # target for the double-buffered per-step working set


def _choose_tile_d(B, D, x_itemsize, y_itemsize):
    """Largest 128-multiple feature strip whose double-buffered x/y blocks fit the budget."""
    if D % 128 != 0:
        return D  # full-extent lane block (small / ragged D, e.g. the D=32 test case)
    # double-buffered x block + double-buffered y block + tiny (1, TD) parameter rows
    bytes_per_col = 2 * B * (x_itemsize + y_itemsize) + 8 * 4
    td = _TILE_BUDGET_BYTES // max(bytes_per_col, 1)
    td = max(128, (td // 128) * 128)
    return min(td, D)


def _bnflow_train_kernel(x_ref, lg_ref, beta_ref, y_ref, mean_ref, var_ref):
    """Training / 'direct': per-feature-strip batch stats + folded affine normalize."""
    x = x_ref[...].astype(jnp.float32)                 # (B, TD)
    lg = lg_ref[...]                                   # (1, TD) f32
    beta = beta_ref[...]                               # (1, TD) f32

    b = x.shape[0]
    mean = jnp.sum(x, axis=0, keepdims=True) * (1.0 / b)
    centered = x - mean
    var = jnp.sum(centered * centered, axis=0, keepdims=True) * (1.0 / b) + EPS

    scale = jnp.exp(lg) * jax.lax.rsqrt(var)           # fold gamma into the scale row
    y_ref[...] = (centered * scale + beta).astype(y_ref.dtype)
    mean_ref[...] = mean
    var_ref[...] = var


def _affine_kernel(x_ref, scale_ref, shift_ref, y_ref):
    """Eval / 'direct': y = x * scale + shift with precomputed per-feature rows."""
    x = x_ref[...].astype(jnp.float32)
    y_ref[...] = (x * scale_ref[...] + shift_ref[...]).astype(y_ref.dtype)


@functools.partial(jax.jit, static_argnames=("training", "tile_d"))
def batch_norm_flow_direct(x, log_gamma, beta, running_mean, running_var,
                           momentum=0.0, training=True, tile_d=None):
    """Forward pass of BatchNormFlow in 'direct' mode.

    Returns (y, logdet, new_running_mean, new_running_var).
      y:       (B, D)  in x.dtype
      logdet:  (1,)    == (log_gamma - 0.5*log(var)).sum(-1, keepdim=True)
    """
    B, D = x.shape
    lg_row = log_gamma.reshape(1, D).astype(jnp.float32)
    beta_row = beta.reshape(1, D).astype(jnp.float32)
    y_dtype = x.dtype

    td = tile_d if tile_d is not None else _choose_tile_d(
        B, D, jnp.dtype(x.dtype).itemsize, jnp.dtype(y_dtype).itemsize)
    assert D % td == 0, "tile_d must evenly divide D"
    n_tiles = D // td

    cparams = pltpu.CompilerParams(
        dimension_semantics=("parallel",),          # feature strips shard across TCs (v7x)
        vmem_limit_bytes=_VMEM_LIMIT_BYTES)

    if training:
        # TODO(synk): for very large B (strip (B, td) exceeding VMEM even at td=128),
        #             restructure as a two-phase grid over B (accumulate sum / sum-of-squares,
        #             then re-stream to normalize). Not needed at these shapes.
        y, bmean, bvar = pl.pallas_call(
            _bnflow_train_kernel,
            grid=(n_tiles,),
            in_specs=[
                pl.BlockSpec((B, td), lambda j: (0, j)),
                pl.BlockSpec((1, td), lambda j: (0, j)),
                pl.BlockSpec((1, td), lambda j: (0, j)),
            ],
            out_specs=[
                pl.BlockSpec((B, td), lambda j: (0, j)),
                pl.BlockSpec((1, td), lambda j: (0, j)),
                pl.BlockSpec((1, td), lambda j: (0, j)),
            ],
            out_shape=[
                jax.ShapeDtypeStruct((B, D), y_dtype),
                jax.ShapeDtypeStruct((1, D), jnp.float32),
                jax.ShapeDtypeStruct((1, D), jnp.float32),
            ],
            compiler_params=cparams,
        )(x, lg_row, beta_row)

        bmean = bmean.reshape(D)
        bvar = bvar.reshape(D)
        # logdet: tiny (D,) reduction on the per-feature var row — done outside the kernel
        # so the feature grid stays fully parallel (no cross-tile accumulator needed).
        logdet = jnp.sum(log_gamma.astype(jnp.float32) - 0.5 * jnp.log(bvar),
                         axis=-1, keepdims=True)
        # Running-buffer update (glue, mirrors the in-place PyTorch update).
        new_rm = running_mean * momentum + bmean * (1.0 - momentum)
        new_rv = running_var * momentum + bvar * (1.0 - momentum)
        return y, logdet, new_rm, new_rv
    else:
        rm = running_mean.astype(jnp.float32).reshape(1, D)
        rv = running_var.astype(jnp.float32).reshape(1, D)
        # Fold the affine: y = x * scale + shift  (2 VPU ops per element in the kernel).
        # Note: eval intentionally does NOT re-add eps (matches the PyTorch module).
        scale = jnp.exp(lg_row) * jax.lax.rsqrt(rv)
        shift = beta_row - rm * scale

        y = pl.pallas_call(
            _affine_kernel,
            grid=(n_tiles,),
            in_specs=[
                pl.BlockSpec((B, td), lambda j: (0, j)),
                pl.BlockSpec((1, td), lambda j: (0, j)),
                pl.BlockSpec((1, td), lambda j: (0, j)),
            ],
            out_specs=pl.BlockSpec((B, td), lambda j: (0, j)),
            out_shape=jax.ShapeDtypeStruct((B, D), y_dtype),
            compiler_params=cparams,
        )(x, scale, shift)

        logdet = jnp.sum(log_gamma.astype(jnp.float32)
                         - 0.5 * jnp.log(running_var.astype(jnp.float32)),
                         axis=-1, keepdims=True)
        return y, logdet, running_mean, running_var

# TODO(synk): mode='inverse' (x_hat = (x - beta)/exp(log_gamma); y = x_hat*sqrt(var)+mean)
#             has the same streaming elementwise structure and is omitted (forward default
#             is 'direct').


def _reference_direct_train(x, log_gamma, beta, eps=EPS):
    mean = x.mean(0)
    var = ((x - mean) ** 2).mean(0) + eps
    x_hat = (x - mean) / jnp.sqrt(var)
    y = jnp.exp(log_gamma) * x_hat + beta
    logdet = jnp.sum(log_gamma - 0.5 * jnp.log(var), axis=-1, keepdims=True)
    return y, logdet, mean, var


if __name__ == "__main__":
    key = jax.random.PRNGKey(0)

    # ---- Case 1: small shapes matching the module (batch=8, num_inputs=32) ----
    B, D = 8, 32
    k1, k2, k3 = jax.random.split(key, 3)
    x = jax.random.normal(k1, (B, D), dtype=jnp.float32) * 2.0 + 0.5
    log_gamma = jax.random.normal(k2, (D,), dtype=jnp.float32) * 0.1
    beta = jax.random.normal(k3, (D,), dtype=jnp.float32) * 0.1
    running_mean = jnp.zeros((D,), jnp.float32)
    running_var = jnp.ones((D,), jnp.float32)

    y, logdet, new_rm, new_rv = batch_norm_flow_direct(
        x, log_gamma, beta, running_mean, running_var,
        momentum=0.0, training=True)
    jax.block_until_ready((y, logdet, new_rm, new_rv))

    y_ref, ld_ref, m_ref, v_ref = _reference_direct_train(x, log_gamma, beta)
    assert jnp.allclose(y, y_ref, atol=1e-5, rtol=1e-5)
    assert jnp.allclose(logdet, ld_ref, atol=1e-5, rtol=1e-5)
    assert jnp.allclose(new_rm, m_ref, atol=1e-5, rtol=1e-5)
    assert jnp.allclose(new_rv, v_ref, atol=1e-5, rtol=1e-5)

    # Eval / direct forward using the (updated) running stats.
    y_e, logdet_e, _, _ = batch_norm_flow_direct(
        x, log_gamma, beta, new_rm, new_rv, momentum=0.0, training=False)
    jax.block_until_ready((y_e, logdet_e))
    assert jnp.allclose(y_e, y_ref, atol=1e-5, rtol=1e-5)
    assert jnp.allclose(logdet_e, ld_ref, atol=1e-5, rtol=1e-5)

    # ---- Case 2: 128-multiple feature dim, forced multi-tile grid (pipelined path) ----
    B2, D2 = 16, 256
    x2 = jax.random.normal(jax.random.PRNGKey(1), (B2, D2), dtype=jnp.float32)
    lg2 = jnp.zeros((D2,), jnp.float32)
    b2 = jnp.zeros((D2,), jnp.float32)
    y2, ld2, rm2, rv2 = batch_norm_flow_direct(
        x2, lg2, b2, jnp.zeros((D2,), jnp.float32), jnp.ones((D2,), jnp.float32),
        momentum=0.0, training=True, tile_d=128)
    jax.block_until_ready((y2, ld2, rm2, rv2))
    y2_ref, ld2_ref, m2_ref, v2_ref = _reference_direct_train(x2, lg2, b2)
    assert jnp.allclose(y2, y2_ref, atol=1e-5, rtol=1e-5)
    assert jnp.allclose(ld2, ld2_ref, atol=1e-4, rtol=1e-5)
    assert jnp.allclose(rm2, m2_ref, atol=1e-5, rtol=1e-5)
    assert jnp.allclose(rv2, v2_ref, atol=1e-5, rtol=1e-5)

    print("KERNEL_OK")
</pallas_src>

<mosaic_0001>
module attributes {stable_mosaic.version = 11 : i64} {
  func.func @_bnflow_train_kernel(%arg0: i32, %arg1: memref<8x32xf32, #tpu.memory_space<vmem>>, %arg2: memref<1x32xf32, #tpu.memory_space<vmem>>, %arg3: memref<1x32xf32, #tpu.memory_space<vmem>>, %arg4: memref<8x32xf32, #tpu.memory_space<vmem>>, %arg5: memref<1x32xf32, #tpu.memory_space<vmem>>, %arg6: memref<1x32xf32, #tpu.memory_space<vmem>>) attributes {dimension_semantics = [#tpu.dimension_semantics<parallel>], iteration_bounds = array<i64: 1>, scalar_prefetch = 0 : i64, scratch_operands = 0 : i64, tpu.core_type = #tpu.core_type<tc>, window_params = [{transform_indices = @transform_0, window_bounds = array<i64: 8, 32>}, {transform_indices = @transform_1, window_bounds = array<i64: 1, 32>}, {transform_indices = @transform_2, window_bounds = array<i64: 1, 32>}, {transform_indices = @transform_3, window_bounds = array<i64: 8, 32>}, {transform_indices = @transform_4, window_bounds = array<i64: 1, 32>}, {transform_indices = @transform_5, window_bounds = array<i64: 1, 32>}]} {
    %c0 = arith.constant 0 : index
    %c0_0 = arith.constant 0 : index
    %0 = vector.load %arg1[%c0, %c0_0] : memref<8x32xf32, #tpu.memory_space<vmem>>, vector<8x32xf32>
    %c0_1 = arith.constant 0 : index
    %c0_2 = arith.constant 0 : index
    %1 = vector.load %arg2[%c0_1, %c0_2] : memref<1x32xf32, #tpu.memory_space<vmem>>, vector<1x32xf32>
    %c0_3 = arith.constant 0 : index
    %c0_4 = arith.constant 0 : index
    %2 = vector.load %arg3[%c0_3, %c0_4] : memref<1x32xf32, #tpu.memory_space<vmem>>, vector<1x32xf32>
    %cst = arith.constant dense<0.000000e+00> : vector<32xf32>
    %3 = vector.multi_reduction <add>, %0, %cst [0] : vector<8x32xf32> to vector<32xf32>
    %4 = vector.shape_cast %3 : vector<32xf32> to vector<1x32xf32>
    %cst_5 = arith.constant 1.250000e-01 : f32
    %5 = vector.broadcast %cst_5 : f32 to vector<1x32xf32>
    %6 = arith.mulf %4, %5 : vector<1x32xf32>
    %7 = vector.broadcast %6 : vector<1x32xf32> to vector<8x32xf32>
    %8 = arith.subf %0, %7 : vector<8x32xf32>
    %9 = arith.mulf %8, %8 : vector<8x32xf32>
    %cst_6 = arith.constant dense<0.000000e+00> : vector<32xf32>
    %10 = vector.multi_reduction <add>, %9, %cst_6 [0] : vector<8x32xf32> to vector<32xf32>
    %11 = vector.shape_cast %10 : vector<32xf32> to vector<1x32xf32>
    %cst_7 = arith.constant 1.250000e-01 : f32
    %12 = vector.broadcast %cst_7 : f32 to vector<1x32xf32>
    %13 = arith.mulf %11, %12 : vector<1x32xf32>
    %cst_8 = arith.constant 9.99999974E-6 : f32
    %14 = vector.broadcast %cst_8 : f32 to vector<1x32xf32>
    %15 = arith.addf %13, %14 : vector<1x32xf32>
    %16 = math.exp %1 : vector<1x32xf32>
    %17 = math.rsqrt %15 : vector<1x32xf32>
    %18 = arith.mulf %16, %17 : vector<1x32xf32>
    %19 = vector.broadcast %18 : vector<1x32xf32> to vector<8x32xf32>
    %20 = arith.mulf %8, %19 : vector<8x32xf32>
    %21 = vector.broadcast %2 : vector<1x32xf32> to vector<8x32xf32>
    %22 = arith.addf %20, %21 : vector<8x32xf32>
    %c0_9 = arith.constant 0 : index
    %c0_10 = arith.constant 0 : index
    %23 = vector.load %arg4[%c0_9, %c0_10] : memref<8x32xf32, #tpu.memory_space<vmem>>, vector<8x32xf32>
    tpu.vector_store %arg4[%c0_9, %c0_10], %22 {strides = array<i32>} : memref<8x32xf32, #tpu.memory_space<vmem>>, vector<8x32xf32>,
    %c0_11 = arith.constant 0 : index
    %c0_12 = arith.constant 0 : index
    %24 = vector.load %arg5[%c0_11, %c0_12] : memref<1x32xf32, #tpu.memory_space<vmem>>, vector<1x32xf32>
    tpu.vector_store %arg5[%c0_11, %c0_12], %6 {strides = array<i32>} : memref<1x32xf32, #tpu.memory_space<vmem>>, vector<1x32xf32>,
    %c0_13 = arith.constant 0 : index
    %c0_14 = arith.constant 0 : index
    %25 = vector.load %arg6[%c0_13, %c0_14] : memref<1x32xf32, #tpu.memory_space<vmem>>, vector<1x32xf32>
    tpu.vector_store %arg6[%c0_13, %c0_14], %15 {strides = array<i32>} : memref<1x32xf32, #tpu.memory_space<vmem>>, vector<1x32xf32>,
    return
  }
  func.func @transform_0(%arg0: i32) -> (i32, i32) {
    %c0_i32 = arith.constant 0 : i32
    %c0_i32_0 = arith.constant 0 : i32
    return %c0_i32, %arg0 : i32, i32
  }
  func.func @transform_1(%arg0: i32) -> (i32, i32) {
    %c0_i32 = arith.constant 0 : i32
    %c0_i32_0 = arith.constant 0 : i32
    return %c0_i32, %arg0 : i32, i32
  }
  func.func @transform_2(%arg0: i32) -> (i32, i32) {
    %c0_i32 = arith.constant 0 : i32
    %c0_i32_0 = arith.constant 0 : i32
    return %c0_i32, %arg0 : i32, i32
  }
  func.func @transform_3(%arg0: i32) -> (i32, i32) {
    %c0_i32 = arith.constant 0 : i32
    %c0_i32_0 = arith.constant 0 : i32
    return %c0_i32, %arg0 : i32, i32
  }
  func.func @transform_4(%arg0: i32) -> (i32, i32) {
    %c0_i32 = arith.constant 0 : i32
    %c0_i32_0 = arith.constant 0 : i32
    return %c0_i32, %arg0 : i32, i32
  }
  func.func @transform_5(%arg0: i32) -> (i32, i32) {
    %c0_i32 = arith.constant 0 : i32
    %c0_i32_0 = arith.constant 0 : i32
    return %c0_i32, %arg0 : i32, i32
  }
}

</mosaic_0001>

<bundles_post_ra>
// kernel: batch_norm_flow_direct.1
= control target key start
LH: loop header
LB: loop body
LE: loop exit
PB: predicated region body
PF: predicated region fallthrough
CT: control target
= control target key end

     0   :  { %vm21_vm0 = vcmask 261120   ;;  %s178_s0 = inlined_call_operand.vmem [shape: f32[8,32], index: 0, kind: input, shape index: {}]   ;;  %s179_s1 = inlined_call_operand.vmem [shape: f32[1,32], index: 1, kind: input, shape index: {}]   ;;  %s180_s2 = inlined_call_operand.vmem [shape: f32[1,32], index: 2, kind: input, shape index: {}]   ;;  %s181_s3 = inlined_call_operand.hbm [shape: f32[8,32], index: 3, kind: output, shape index: {0}]   ;;  %s182_s4 = inlined_call_operand.vmem [shape: f32[1,32], index: 4, kind: output, shape index: {1}]   ;;  %s183_s5 = inlined_call_operand.vmem [shape: f32[1,32], index: 5, kind: output, shape index: {2}]  }
   0x1   :  { %v18_v0 = vld [vmem:[%s178_s0] sm:$0xff] }
   0x2   :  { %v22_v1 = vsel %vm21_vm0, %v18_v0, 0.0 }
   0x3   :  { %11 = vsyncpa [#allocation3], 0  ;;  %v23_v2 = vrot.slane %v22_v1, 4  ;;  %vm60_vm1 = vcmask 253952   ;;  %v19_v16 = vld [vmem:[%s179_s1] sm:$0x1]  ;;  %v46_v22 = vlaneseq }
   0x4   :  { %v41_v19 = vmul.f32 1.442695, %v19_v16  ;;  %v85_v29 = vld [vmem:[%s180_s2] ss:$0 sm:$0xff]  ;;  %s115_s25 = smov [#allocation2]  }
   0x5   :  { %v24_v3 = vadd.f32 %v23_v2, %v22_v1  ;;  %v47_v23 = vshrl.u32 %v46_v22, 7  ;;  %s69_s26 = sshll.u32 %s115_s25, 4  ;;  %s70_s26 = int_to_ptr.vmem [resolvable:$true] %s69_s26 }
   0x6   :  { %87 = vpow2.f32 %v41_v19  ;;  %s91_s27 = scalar_lea.vmem %s70_s26, 128  ;;  %p96_p1 = scmp.lt.s32.totalorder %s70_s26, %s70_s26 }
   0x7   :  { %v25_v4 = vrot.slane %v24_v3, 2  ;;  %v48_v25 = vsub.s32 0, %v47_v23  ;;  %p92_p0 = scmp.ne.s32.totalorder %s70_s26, %s91_s27  ;;  %p97_p2 = scmp.lt.s32.totalorder %s91_s27, %s91_s27 }
   0x9   :  { %v26_v5 = vadd.f32 %v25_v4, %v24_v3  ;;  %p98_p3 = por %p97_p2, %p96_p1 }
   0xb   :  { %v27_v6 = vrot.slane %v26_v5, 1  ;;  %p99_p4 = pnand %p98_p3, %p92_p0 }
   0xd   :  { %v28_v7 = vadd.f32 %v27_v6, %v26_v5 }
   0xf   :  { %v29_v8 = vmul.f32 0.125, %v28_v7 }
  0x10   :  { %v88_v24 = vpop.eup %87 }
  0x11   :  { %v30_v9 = vsub.f32 %v18_v0, %v29_v8  ;;  %61 = vst.msk [vmem:[%s182_s4] sm:$0x1] %vm60_vm1, %v29_v8 }
  0x13   :  { %v31_v10 = vmul.f32 %v30_v9, %v30_v9 }
  0x15   :  { %v32_v11 = vsel %vm21_vm0, %v31_v10, 0.0 }
  0x16   :  { %v33_v12 = vrot.slane %v32_v11, 4 }
  0x18   :  { %v34_v13 = vadd.f32 %v33_v12, %v32_v11 }
  0x1a   :  { %v35_v14 = vrot.slane %v34_v13, 2 }
  0x1c   :  { %v36_v15 = vadd.f32 %v35_v14, %v34_v13 }
  0x1e   :  { %v37_v17 = vrot.slane %v36_v15, 1 }
  0x20   :  { %v38_v18 = vadd.f32 %v37_v17, %v36_v15 }
  0x22   :  { %v39_v20 = vmul.f32 0.125, %v38_v18 }
  0x24   :  { %v40_v21 = vadd.f32 1e-05, %v39_v20 }
  0x26   :  { %89 = vrsqrt.f32 %v40_v21  ;;  %62 = vst.msk [vmem:[%s183_s5] sm:$0x1] %vm60_vm1, %v40_v21 }
  0x30   :  { %v90_v26 = vpop.eup %89 }
  0x31   :  { %v44_v27 = vmul.f32 %v90_v26, %v88_v24 }
  0x33   :  { %v49_v28 = vrot.slane %v44_v27, %v48_v25 }
  0x35   :  { %v51_v30 = vmul.f32 %v49_v28, %v30_v9 }
  0x37   :  { %v58_v31 = vadd.f32 %v85_v29, %v51_v30 }
  0x39   :  { %59 = vst.msk [vmem:[#allocation2] sm:$0xff] %vm21_vm0, %v58_v31 }
  0x3a   :  { %102 = shalt.err (!%p99_p4)
}
  0x3b   :  { %s103_s29 = scalar_lea.hbm %s181_s3, 128 }
  0x3c   :  { %p104_p5 = scmp.ne.s32.totalorder %s181_s3, %s103_s29  ;;  %p107_p6 = scmp.lt.u32.totalorder %s103_s29, %s181_s3 }
  0x3e   :  { %p109_p7 = pnand %p107_p6, %p104_p5 }
  0x40   :  { %112 = shalt.err (!%p109_p7)
}
  0x41   :  { %72 = dma.vmem_to_hbm [thread:$0]  %s70_s26, 128, %s181_s3, [#allocation3]  }
  0x42   :  { %113 = dma.done.wait [#allocation3], 128  }
  0x43   :  { %114 = vsyncadd [#allocation3], 4294967168 }
  0x44   :  { %84 = vsyncpa [#allocation3], 1 }

</bundles_post_ra>
